<compile_context>
chip_gen: v7x
topology: tpu7x:2x2x1
jax: 0.10.0
libtpu: 0.0.40
codegen_flags: <defaults>
</compile_context>

<pallas_src>
import functools

import jax
import jax.numpy as jnp
from jax.experimental import pallas as pl
from jax.experimental.pallas import tpu as pltpu

# --- model hyper-params (consistent with the module) ---
NUM_OBS = 24
NUM_ACT = 4
CRITIC_HIDDEN_DIM = (64, 32)
H0, H1 = CRITIC_HIDDEN_DIM          # 64, 32

LANE = 128

# Transposed input slab layout (rows = features, lanes = batch):
#   rows 0:24  state^T | 24:28 action^T | 28 const-1 (feeds b1) | 29:32 zero
IN_COLS = 32
IN_CONST_ROW = NUM_OBS + NUM_ACT     # 28

# Hidden-input rows fed to fc2:
#   rows 0:64 fc1 output | 64:68 action | 68 const-1 (feeds b2) | 69:72 zero
HIN_ROWS = H0 + 8                    # 72
HIN_CONST_ROW = H0 + NUM_ACT         # 68

# fc2 output rows (padded): 0:32 fc2 out | 32 const-1 (feeds b3) | 33:40 zero
H_ROWS = 40

# Packed parameter slab (SLAB_ROWS, 128):
#   rows   0: 64  -> W1^T   (lanes 0:24 = w1^T, lane 28 = b1)
#   rows  64:104  -> W2^T   (lanes 0:64 = w2_state^T, 64:68 = w2_action^T,
#                            lane 68 = b2; row 96 lane 68 = 1.0 const source)
#   rows 104:112  -> w3 row (row 104: lanes 0:32 = w3, lane 32 = b3)
W2_ROW0 = H0                         # 64
W3_ROW0 = W2_ROW0 + H_ROWS           # 104
SLAB_ROWS = W3_ROW0 + 8              # 112


def critic_kernel(x_ref, w_ref, o_ref):
    f32 = jnp.float32
    x = x_ref[...]                                         # (32, TILE_B)

    w1t = w_ref[0:H0, 0:IN_COLS]                           # (64, 32)
    w2t = w_ref[W2_ROW0:W2_ROW0 + H_ROWS, 0:HIN_ROWS]      # (40, 72)
    w3r = w_ref[W3_ROW0:W3_ROW0 + 8, 0:H_ROWS]             # (8, 40), row 0 used

    # fc1 (+ b1 folded via the const-1 input row): (64, TILE_B), f32
    xs = jnp.maximum(
        jnp.dot(w1t, x, preferred_element_type=f32), 0.0)

    # Inject [action | 1 | 0,0,0] at hidden rows 64:72 (post-ReLU, so negative
    # actions are NOT clamped).  One aligned sublane concat -> (72, TILE_B).
    aug = x[NUM_OBS:IN_COLS, :].astype(f32)                # (8, TILE_B)
    hin = jnp.concatenate([xs, aug], axis=0)               # (72, TILE_B)

    # fc2 over concat([xs, action]) in ONE dot; b2 + the fc3-bias const-1 row
    # are folded into the weight slab.  -> (40, TILE_B), f32
    h = jnp.maximum(
        jnp.dot(w2t, hin.astype(w2t.dtype), preferred_element_type=f32), 0.0)

    # fc3 matvec (b3 rides the const-1 row at index 32) -> lane-dense (1, TILE_B)
    q = jnp.dot(w3r, h.astype(w3r.dtype), preferred_element_type=f32)  # (8, TILE_B)
    o_ref[...] = q[0:1, :]


@functools.partial(jax.jit, static_argnames=("tile_b",))
def critic_forward(state, action, w_slab, *, tile_b=None):
    """state: (B, 24) f32, action: (B, 4) f32, w_slab: packed params -> (B, 1) f32."""
    b = state.shape[0]
    if tile_b is None:
        # Large tiles amortize the ~0.35us/step fixed cost; keep >=2 grid steps
        # at replay-batch sizes so the "parallel" axis can split across v7x's
        # two TensorCores.
        tile_b = 512 if b >= 1024 else 256
    n_steps = pl.cdiv(b, tile_b)
    bp = n_steps * tile_b
    dt = w_slab.dtype  # bf16 packing halves input/weight DMA bytes; MXU-native on v6e/v7x

    # Single transposed input slab: [state^T ; action^T ; 1 ; 0] -> (32, B)
    x_t = jnp.concatenate([
        state.T.astype(dt),
        action.T.astype(dt),
        jnp.ones((1, b), dt),
        jnp.zeros((IN_COLS - NUM_OBS - NUM_ACT - 1, b), dt),
    ], axis=0)
    if bp != b:  # pad batch (lanes) to a tile multiple; sliced off below
        x_t = jnp.pad(x_t, ((0, 0), (0, bp - b)))

    q = pl.pallas_call(
        critic_kernel,
        out_shape=jax.ShapeDtypeStruct((1, bp), jnp.float32),
        grid_spec=pltpu.PrefetchScalarGridSpec(
            num_scalar_prefetch=0,
            grid=(n_steps,),
            in_specs=[
                pl.BlockSpec((IN_COLS, tile_b), lambda i: (0, i)),
                # Constant index_map -> fetched once, VMEM-resident.
                pl.BlockSpec((SLAB_ROWS, LANE), lambda i: (0, 0)),
            ],
            out_specs=pl.BlockSpec((1, tile_b), lambda i: (0, i)),  # lane-dense rows
        ),
        compiler_params=pltpu.CompilerParams(
            dimension_semantics=("parallel",)),  # megacore split on v7x
    )(x_t, w_slab)
    return q[0, :b].reshape(b, 1)


def init_params(key):
    """Deterministic init mimicking the PyTorch module's reset_parameters."""
    h0, h1 = CRITIC_HIDDEN_DIM
    k = jax.random.split(key, 6)

    def uniform(rng, shape, lim):
        return jax.random.uniform(rng, shape, jnp.float32, -lim, lim)

    # NB: hidden_init uses weight.size()[0] == out_features (as in the reference).
    w1 = uniform(k[0], (NUM_OBS, h0), 1.0 / jnp.sqrt(h0))
    b1 = uniform(k[1], (h0,), 1.0 / jnp.sqrt(NUM_OBS))          # default Linear bias init
    w2 = uniform(k[2], (h0 + NUM_ACT, h1), 1.0 / jnp.sqrt(h1))
    b2 = uniform(k[3], (h1,), 1.0 / jnp.sqrt(h0 + NUM_ACT))
    w3 = uniform(k[4], (h1, 1), 0.003)
    b3 = uniform(k[5], (1,), 1.0 / jnp.sqrt(h1))
    return (w1, b1, w2, b2, w3, b3)


def pack_params(params, dtype=jnp.bfloat16):
    """Pack all weights + biases into one transposed (112, 128) slab."""
    w1, b1, w2, b2, w3, b3 = params
    w2s, w2a = w2[:H0, :], w2[H0:, :]

    slab = jnp.zeros((SLAB_ROWS, LANE), jnp.float32)
    # fc1 block: W1^T with b1 folded via the const-1 input row (row 28).
    slab = slab.at[0:H0, 0:NUM_OBS].set(w1.T)
    slab = slab.at[0:H0, IN_CONST_ROW].set(b1)
    # fc2 block: [w2_state^T | w2_action^T | b2] + const-1 generator row.
    slab = slab.at[W2_ROW0:W2_ROW0 + H1, 0:H0].set(w2s.T)
    slab = slab.at[W2_ROW0:W2_ROW0 + H1, H0:H0 + NUM_ACT].set(w2a.T)
    slab = slab.at[W2_ROW0:W2_ROW0 + H1, HIN_CONST_ROW].set(b2)
    slab = slab.at[W2_ROW0 + H1, HIN_CONST_ROW].set(1.0)   # h row 32 == 1.0 -> carries b3
    # fc3 row: w3 with b3 riding the const-1 hidden row.
    slab = slab.at[W3_ROW0, 0:H1].set(w3[:, 0])
    slab = slab.at[W3_ROW0, H1].set(b3[0])
    return slab.astype(dtype)


def critic_reference(state, action, params):
    """Pure-JAX reference mirroring the PyTorch forward (explicit concat)."""
    w1, b1, w2, b2, w3, b3 = params
    xs = jax.nn.relu(state @ w1 + b1)
    x = jnp.concatenate([xs, action], axis=1)
    x = jax.nn.relu(x @ w2 + b2)
    return x @ w3 + b3


if __name__ == "__main__":
    key = jax.random.PRNGKey(0)
    k_param, k_state, k_action = jax.random.split(key, 3)

    params = init_params(k_param)

    BATCH = 512  # typical DDPG replay batch; exercises a 2-step "parallel" grid
    state = jax.random.normal(k_state, (BATCH, NUM_OBS), jnp.float32)
    action = jax.random.uniform(k_action, (BATCH, NUM_ACT), jnp.float32, -1.0, 1.0)
    q_ref = critic_reference(state, action, params)

    # f32-packed path: tight parity with the reference.
    slab_f32 = pack_params(params, jnp.float32)
    q32 = jax.block_until_ready(critic_forward(state, action, slab_f32))
    assert q32.shape == (BATCH, 1)
    assert jnp.allclose(q32, q_ref, atol=1e-4, rtol=1e-4), "mismatch vs reference (f32)"

    # bf16-packed path (default): MXU-native operands on v6e/v7x, half the DMA bytes.
    slab_bf16 = pack_params(params)
    qbf = jax.block_until_ready(critic_forward(state, action, slab_bf16))
    assert qbf.shape == (BATCH, 1)
    assert jnp.allclose(qbf, q_ref, atol=1e-2, rtol=1e-2), "mismatch vs reference (bf16)"

    # Batch-padding path (batch not a multiple of the tile).
    q_small = jax.block_until_ready(critic_forward(state[:8], action[:8], slab_f32))
    assert q_small.shape == (8, 1)
    assert jnp.allclose(q_small, q_ref[:8], atol=1e-4, rtol=1e-4), "mismatch (padded batch)"

    print("KERNEL_OK")
</pallas_src>

<mosaic_0001>
module attributes {stable_mosaic.version = 11 : i64} {
  func.func @critic_kernel(%arg0: i32, %arg1: memref<32x256xf32, #tpu.memory_space<vmem>>, %arg2: memref<112x128xf32, #tpu.memory_space<vmem>>, %arg3: memref<1x256xf32, #tpu.memory_space<vmem>>) attributes {dimension_semantics = [#tpu.dimension_semantics<parallel>], iteration_bounds = array<i64: 2>, scalar_prefetch = 0 : i64, scratch_operands = 0 : i64, tpu.core_type = #tpu.core_type<tc>, window_params = [{transform_indices = @transform_0, window_bounds = array<i64: 32, 256>}, {pipeline_mode = #tpu.pipeline_mode<synchronous>, transform_indices = @transform_1, window_bounds = array<i64: 112, 128>}, {transform_indices = @transform_2, window_bounds = array<i64: 1, 256>}]} {
    %c0 = arith.constant 0 : index
    %c0_0 = arith.constant 0 : index
    %0 = vector.load %arg1[%c0, %c0_0] : memref<32x256xf32, #tpu.memory_space<vmem>>, vector<32x256xf32>
    %c0_1 = arith.constant 0 : index
    %c0_2 = arith.constant 0 : index
    %1 = vector.load %arg2[%c0_1, %c0_2] : memref<112x128xf32, #tpu.memory_space<vmem>>, vector<64x32xf32>
    %c64 = arith.constant 64 : index
    %c0_3 = arith.constant 0 : index
    %2 = vector.load %arg2[%c64, %c0_3] : memref<112x128xf32, #tpu.memory_space<vmem>>, vector<40x72xf32>
    %c104 = arith.constant 104 : index
    %c0_4 = arith.constant 0 : index
    %3 = vector.load %arg2[%c104, %c0_4] : memref<112x128xf32, #tpu.memory_space<vmem>>, vector<8x40xf32>
    %cst = arith.constant dense<0.000000e+00> : vector<64x256xf32>
    %4 = tpu.matmul %1, %0, %cst {dimension_numbers = #tpu.dot_dimension_numbers<[1], [0], [0], [1], [0, 0, 1, 1], [], []>} : vector<64x32xf32>, vector<32x256xf32>, vector<64x256xf32> -> vector<64x256xf32>
    %cst_5 = arith.constant 0.000000e+00 : f32
    %5 = vector.broadcast %cst_5 : f32 to vector<64x256xf32>
    %6 = arith.maximumf %4, %5 : vector<64x256xf32>
    %7 = vector.extract_strided_slice %0 {offsets = [24, 0], sizes = [8, 256], strides = [1, 1]} : vector<32x256xf32> to vector<8x256xf32>
    %8 = tpu.concatenate %6, %7 in 0 : vector<64x256xf32>, vector<8x256xf32> -> vector<72x256xf32>
    %cst_6 = arith.constant dense<0.000000e+00> : vector<40x256xf32>
    %9 = tpu.matmul %2, %8, %cst_6 {dimension_numbers = #tpu.dot_dimension_numbers<[1], [0], [0], [1], [0, 0, 1, 1], [], []>} : vector<40x72xf32>, vector<72x256xf32>, vector<40x256xf32> -> vector<40x256xf32>
    %cst_7 = arith.constant 0.000000e+00 : f32
    %10 = vector.broadcast %cst_7 : f32 to vector<40x256xf32>
    %11 = arith.maximumf %9, %10 : vector<40x256xf32>
    %cst_8 = arith.constant dense<0.000000e+00> : vector<8x256xf32>
    %12 = tpu.matmul %3, %11, %cst_8 {dimension_numbers = #tpu.dot_dimension_numbers<[1], [0], [0], [1], [0, 0, 1, 1], [], []>} : vector<8x40xf32>, vector<40x256xf32>, vector<8x256xf32> -> vector<8x256xf32>
    %13 = vector.extract_strided_slice %12 {offsets = [0, 0], sizes = [1, 256], strides = [1, 1]} : vector<8x256xf32> to vector<1x256xf32>
    %c0_9 = arith.constant 0 : index
    %c0_10 = arith.constant 0 : index
    %14 = vector.load %arg3[%c0_9, %c0_10] : memref<1x256xf32, #tpu.memory_space<vmem>>, vector<1x256xf32>
    tpu.vector_store %arg3[%c0_9, %c0_10], %13 {strides = array<i32>} : memref<1x256xf32, #tpu.memory_space<vmem>>, vector<1x256xf32>,
    return
  }
  func.func @transform_0(%arg0: i32) -> (i32, i32) {
    %c0_i32 = arith.constant 0 : i32
    %c0_i32_0 = arith.constant 0 : i32
    return %c0_i32, %arg0 : i32, i32
  }
  func.func @transform_1(%arg0: i32) -> (i32, i32) {
    %c0_i32 = arith.constant 0 : i32
    %c0_i32_0 = arith.constant 0 : i32
    %c0_i32_1 = arith.constant 0 : i32
    return %c0_i32, %c0_i32_0 : i32, i32
  }
  func.func @transform_2(%arg0: i32) -> (i32, i32) {
    %c0_i32 = arith.constant 0 : i32
    %c0_i32_0 = arith.constant 0 : i32
    return %c0_i32, %arg0 : i32, i32
  }
}

</mosaic_0001>

<bundles_post_ra>
// kernel: critic_forward.1
= control target key start
LH: loop header
LB: loop body
LE: loop exit
PB: predicated region body
PF: predicated region fallthrough
CT: control target
= control target key end

     0   :  { %7 = vsyncpa [#allocation4], 0  ;;  %s1020_s0 = inlined_call_operand.vmem [shape: f32[32,512], index: 0, kind: input, shape index: {}]   ;;  %s1021_s1 = inlined_call_operand.vmem [shape: f32[112,128], index: 1, kind: input, shape index: {}]   ;;  %s1022_s2 = inlined_call_operand.hbm [shape: f32[1,512], index: 2, kind: output, shape index: {}]  }
   0x1   :  { %9 = vsyncpa [#allocation4 + $0x1], 0  ;;  %s838_s9 = smov 0   ;;  %s840_s10 = smov 0  }
   0x2   :  { %s842_s11 = smov 0   ;;  %s844_s12 = smov 0  }
   0x3 LB: > { %s652_s13 = sadd.s32 4294967295, %s818_s12   ;;  %s653_s14 = sadd.s32 4294967294, %s818_s12   ;;  %s818_s12 = sphi %s844_s12, %s1028_s12   ;;  %s814_s11 = sphi %s842_s11, %s1027_s11   ;;  %s810_s10 = sphi %s840_s10, %s1026_s10   ;;  %s806_s9 = sphi %s838_s9, %s1025_s9  }
   0x4   : > { %s861_s15 = sadd.s32 1, %s818_s12   ;;  %s22_s16 = sadd.s32 1, %s814_s11 }
   0x5   : > { %s19_s17 = ssub.s32 %s818_s12, %s861_s15  ;;  %p29_p0 = scmp.ne.s32.totalorder %s814_s11, %s810_s10 }
   0x6   : > { %p20_p1 = scmp.eq.s32.totalorder %s19_s17, 0  ;;  %p30_p2 = scmp.eq.s32.totalorder %s818_s12, 0 }
   0x7   : > { %p80_p3 = scmp.eq.s32.totalorder %s652_s13, 1  ;;  %p85_p4 = scmp.ne.s32.totalorder %s810_s10, %s806_s9 }
   0x8   : > { %s874_s18 = scalar_select %p20_p1, %s814_s11, %s22_s16  }
   0x9   : > { %p31_p5 = por %p30_p2, %p29_p0  ;;  %p876_p6 = por %p80_p3, %p29_p0 }
   0xa   : > { %p86_p7 = scmp.eq.s32.totalorder %s653_s14, 1  ;;  %p655_p9 = scmp.ge.s32.totalorder %s818_s12, 2 }
   0xc   : > { %p880_p8 = por %p86_p7, %p85_p4  ;;  %105 = sbr.rel (%p655_p9) target bundleno = 27 (0x1b), region = 20 }
  0x13   : > { %108 = sbr.rel (!%p31_p5) target bundleno = 27 (0x1b), region = 24  ;;  %s110_s21 = sand.u32 (%p31_p5), 1, %s814_s11  }
  0x14   : > { %s681_s22 = sshll.u32 (%p31_p5), %s818_s12, 4  ;;  %s656_s23 = sshll.u32 (%p31_p5), %s110_s21, 6 }
  0x15   : > { %s115_s26 = scalar_lea.vmem (%p31_p5), %s1020_s0, %s681_s22  ;;  %s112_s27 = scalar_lea.vmem (%p31_p5), [#allocation2], %s656_s23 }
  0x16   : > { %v128_v0 = vld [vmem:[%s115_s26] sm:$0xff] (%p31_p5)  ;;  %v130_v1 = vld [vmem:[%s115_s26 + $0x8] sm:$0xff] (%p31_p5) }
  0x17   : > { %v132_v2 = vld [vmem:[%s115_s26 + $0x20] sm:$0xff] (%p31_p5)  ;;  %129 = vst [vmem:[%s112_s27] sm:$0xff] (%p31_p5), %v128_v0  ;;  %131 = vst [vmem:[%s112_s27 + $0x8] sm:$0xff] (%p31_p5), %v130_v1  ;;  %v134_v3 = vld [vmem:[%s115_s26 + $0x28] sm:$0xff] (%p31_p5) }
  0x18   : > { %133 = vst [vmem:[%s112_s27 + $0x10] sm:$0xff] (%p31_p5), %v132_v2  ;;  %v136_v4 = vld [vmem:[%s115_s26 + $0x40] sm:$0xff] (%p31_p5)  ;;  %v138_v5 = vld [vmem:[%s115_s26 + $0x48] sm:$0xff] (%p31_p5)  ;;  %135 = vst [vmem:[%s112_s27 + $0x18] sm:$0xff] (%p31_p5), %v134_v3 }
  0x19   : > { %137 = vst [vmem:[%s112_s27 + $0x20] sm:$0xff] (%p31_p5), %v136_v4  ;;  %139 = vst [vmem:[%s112_s27 + $0x28] sm:$0xff] (%p31_p5), %v138_v5  ;;  %v140_v6 = vld [vmem:[%s115_s26 + $0x60] sm:$0xff] (%p31_p5)  ;;  %v142_v7 = vld [vmem:[%s115_s26 + $0x68] sm:$0xff] (%p31_p5) }
  0x1a   : > { %141 = vst [vmem:[%s112_s27 + $0x30] sm:$0xff] %v140_v6  ;;  %143 = vst [vmem:[%s112_s27 + $0x38] sm:$0xff] %v142_v7 }
  0x1b PF: > { %p659_p10 = scmp.ge.s32.totalorder %s818_s12, 1  ;;  %p148_p11 = scmp.lt.s32.totalorder %s818_s12, 3 }
  0x1d   : > { %p149_p12 = pnand %p659_p10, %p148_p11 }
  0x1e   : > { %s895_s28 = sand.u32 (!%p149_p12), 1, %s810_s10   ;;  %v820_v8 = vmov (!%p149_p12), 0.0   ;;  %v186_v21 = vld [vmem:[%s1021_s1] sm:$0xff] (!%p149_p12)  ;;  %vm200_vm0 = vcmask (!%p149_p12), 261120   ;;  %v187_v22 = vld [vmem:[%s1021_s1 + $0x8] sm:$0xff] (!%p149_p12)  ;;  %v188_v23 = vld [vmem:[%s1021_s1 + $0x10] sm:$0xff] (!%p149_p12) }
  0x1f   : > { %152 = sbr.rel (%p149_p12) target bundleno = 763 (0x2fb), region = 47  ;;  %s660_s29 = sshll.u32 (!%p149_p12), %s895_s28, 6  ;;  %289 = vmatprep.mubr.f32.mxu0 (!%p149_p12), %v820_v8  ;;  %434 = vmatprep.mubr.f32.mxu1 (!%p149_p12), %v820_v8  ;;  %v189_v24 = vld [vmem:[%s1021_s1 + $0x18] sm:$0xff] (!%p149_p12)  ;;  %v190_v25 = vld [vmem:[%s1021_s1 + $0x20] sm:$0xff] (!%p149_p12)  ;;  %v191_v26 = vld [vmem:[%s1021_s1 + $0x28] sm:$0xff] (!%p149_p12)  ;;  %vm354_vm1 = vcmask (!%p149_p12), 588800  }
  0x20   : > { %s157_s30 = scalar_lea.vmem (!%p149_p12), [#allocation2], %s660_s29  ;;  %v192_v27 = vld [vmem:[%s1021_s1 + $0x30] sm:$0xff] (!%p149_p12)  ;;  %v193_v28 = vld [vmem:[%s1021_s1 + $0x38] sm:$0xff] (!%p149_p12)  ;;  %v194_v5 = vld [vmem:[%s1021_s1 + $0x40] sm:$0xff] (!%p149_p12)  ;;  %vm475_vm2 = vcmask (!%p149_p12), 326656   ;;  %s661_s22 = sshll.u32 (!%p149_p12), %s895_s28, 1 }
  0x21   : > { %v179_v9 = vld [vmem:[%s157_s30 + $0x8] sm:$0xff] (!%p149_p12)  ;;  %v181_v10 = vld [vmem:[%s157_s30 + $0x18] sm:$0xff] (!%p149_p12)  ;;  %v178_v11 = vld [vmem:[%s157_s30] sm:$0xff] (!%p149_p12)  ;;  %s682_s23 = sshll.u32 (!%p149_p12), %s652_s13, 5  ;;  %s175_s24 = scalar_lea.vmem (!%p149_p12), [#allocation3], %s661_s22 }
  0x22   : > { %v683_v12 = vpack.c.bf16 (!%p149_p12), %v181_v10, %v179_v9  ;;  %v180_v13 = vld [vmem:[%s157_s30 + $0x10] sm:$0xff] (!%p149_p12)  ;;  %v183_v14 = vld [vmem:[%s157_s30 + $0x28] sm:$0xff] (!%p149_p12)  ;;  %v900_v15 = vld [vmem:[%s157_s30 + $0x38] sm:$0xff] (!%p149_p12)  ;;  %s588_s25 = sshll.u32 (!%p149_p12), %s175_s24, 4  ;;  %s976_s29 = scalar_lea.hbm (!%p149_p12), %s1022_s2, %s682_s23  ;;  %s978_s25 = int_to_ptr.vmem [resolvable:$true] %s588_s25 }
  0x23   : > { %v685_v16 = vpack.c.bf16 (!%p149_p12), %v180_v13, %v178_v11  ;;  %v687_v17 = vpack.c.bf16 (!%p149_p12), %v900_v15, %v183_v14  ;;  %v182_v18 = vld [vmem:[%s157_s30 + $0x20] sm:$0xff] (!%p149_p12)  ;;  %v903_v19 = vld [vmem:[%s157_s30 + $0x30] sm:$0xff] (!%p149_p12)  ;;  %v195_v6 = vld [vmem:[%s1021_s1 + $0x48] sm:$0xff] (!%p149_p12)  ;;  %s574_s30 = scalar_lea.sflag (!%p149_p12), [#allocation4], %s895_s28  ;;  %s756_s3 = scalar_lea.vmem (!%p149_p12), %s978_s25, 32 }
  0x24   : > { %684 = vmatprep.subr.bf16.mxu0 (!%p149_p12), %v683_v12  ;;  %v689_v20 = vpack.c.bf16 (!%p149_p12), %v903_v19, %v182_v18  ;;  %v196_v7 = vld [vmem:[%s1021_s1 + $0x50] sm:$0xff] (!%p149_p12)  ;;  %v197_v9 = vld [vmem:[%s1021_s1 + $0x58] sm:$0xff] (!%p149_p12)  ;;  %v198_v10 = vld [vmem:[%s1021_s1 + $0x60] sm:$0xff] (!%p149_p12)  ;;  %p757_p13 = scmp.ne.s32.totalorder (!%p149_p12), %s978_s25, %s756_s3  ;;  %s822_s13 = smov (!%p149_p12), [#allocation3]  }
  0x25   : > { %686 = vmatpush1.bf16.msra.mxu0 (!%p149_p12), %v685_v16  ;;  %s760_s4 = sshll.u32 (!%p149_p12), %s822_s13, 4  ;;  %s761_s4 = int_to_ptr.vmem [resolvable:$false] %s760_s4 }
  0x26   : > { %688 = vmatprep.subr.bf16.mxu0 %v687_v17  ;;  %p758_p0 = pnand %p757_p13, %p876_p6  ;;  %s762_s5 = scalar_lea.vmem %s761_s4, 64 }
  0x27   : > { %p763_p2 = scmp.lt.s32.totalorder %s978_s25, %s761_s4  ;;  %p764_p3 = scmp.lt.s32.totalorder %s762_s5, %s756_s3 }
  0x28   : > { %p759_p1 = pneg %p758_p0 }
  0x29   : > { %690 = vmatpush1.bf16.msra.mxu0 %v689_v20  ;;  %p765_p4 = por %p764_p3, %p763_p2 }
  0x2b   : > { %p766_p5 = pnand %p765_p4, %p759_p1 }
  0x2c   : > { %662 = vmatmul.mubr.msk.f32.vlgmr.msra.gmra.mrb[0].mxu0 %vm200_vm0, %v186_v21 }
  0x2d   : > { %295 = vmatprep.mubr.f32.mxu0 %v820_v8 }
  0x30   : > { %663 = vmatmul.mubr.msk.f32.gmra.mrb[2].mxu0 %vm200_vm0, %v187_v22 }
  0x31   : > { %301 = vmatprep.mubr.f32.mxu0 %v820_v8 }
  0x34   : > { %664 = vmatmul.mubr.msk.f32.gmra.mrb[4].mxu0 %vm200_vm0, %v188_v23 }
  0x35   : > { %307 = vmatprep.mubr.f32.mxu0 %v820_v8 }
  0x38   : > { %665 = vmatmul.mubr.msk.f32.gmra.mrb[6].mxu0 %vm200_vm0, %v189_v24 }
  0x39   : > { %313 = vmatprep.mubr.f32.mxu0 %v820_v8 }
  0x3c   : > { %666 = vmatmul.mubr.msk.f32.gmra.mrb[8].mxu0 %vm200_vm0, %v190_v25 }
  0x3d   : > { %319 = vmatprep.mubr.f32.mxu0 %v820_v8 }
  0x40   : > { %667 = vmatmul.mubr.msk.f32.gmra.mrb[10].mxu0 %vm200_vm0, %v191_v26 }
  0x41   : > { %325 = vmatprep.mubr.f32.mxu0 %v820_v8 }
  0x44   : > { %668 = vmatmul.mubr.msk.f32.gmra.mrb[12].mxu0 %vm200_vm0, %v192_v27 }
  0x45   : > { %331 = vmatprep.mubr.f32.mxu0 %v820_v8 }
  0x48   : > { %669 = vmatmul.mubr.msk.f32.gmra.mrb[14].mxu0 %vm200_vm0, %v193_v28 }
  0xff   : > { %v291_v29 = vpop.f32.mrb[0].mxu0 }
 0x100   : > { %v293_v30 = vpop.f32.mrb[1].mxu0  ;;  %v338_v32 = vmax.f32 %v291_v29, 0.0 }
 0x101   : > { %v339_v35 = vmax.f32 %v293_v30, 0.0 }
 0x103   : > { %v297_v31 = vpop.f32.mrb[2].mxu0 }
 0x104   : > { %v340_v33 = vmax.f32 %v297_v31, 0.0  ;;  %v299_v34 = vpop.f32.mrb[3].mxu0 }
 0x105   : > { %v341_v36 = vmax.f32 %v299_v34, 0.0  ;;  %v199_v34 = vld [vmem:[%s1021_s1 + $0x68] sm:$0xff] }
 0x106   : > { %v693_v37 = vpack.c.bf16 %v340_v33, %v338_v32 }
 0x107   : > { %v303_v38 = vpop.f32.mrb[4].mxu0  ;;  %v691_v39 = vpack.c.bf16 %v341_v36, %v339_v35  ;;  %v821_v35 = vmov 1966171168  }
 0x108   : > { %v305_v40 = vpop.f32.mrb[5].mxu0  ;;  %v342_v42 = vmax.f32 %v303_v38, 0.0  ;;  %v554_v36 = vunpack.c.l.s4 %v821_v35 }
 0x109   : > { %692 = vmatprep.subr.bf16.mxu1 %v691_v39  ;;  %v343_v45 = vmax.f32 %v305_v40, 0.0 }
 0x10a   : > { %694 = vmatpush1.bf16.msra.mxu1 %v693_v37  ;;  %v556_v37 = vlaneseq  ;;  %v555_v38 = vunpack.c.0.s8 %v554_v36 }
 0x10b   : > { %v309_v41 = vpop.f32.mrb[6].mxu0 }
 0x10c   : > { %v344_v43 = vmax.f32 %v309_v41, 0.0  ;;  %v311_v44 = vpop.f32.mrb[7].mxu0  ;;  %v557_v39 = vshrl.u32 %v556_v37, 7  ;;  %vm570_vm3 = vcmp.lt.s32.totalorder %v556_v37, 256 }
 0x10d   : > { %v345_v46 = vmax.f32 %v311_v44, 0.0 }
 0x10e   : > { %v697_v47 = vpack.c.bf16 %v344_v43, %v342_v42  ;;  %v558_v41 = vsub.s32 %v555_v38, %v557_v39 }
 0x10f   : > { %v695_v48 = vpack.c.bf16 %v345_v46, %v343_v45  ;;  %v315_v49 = vpop.f32.mrb[8].mxu0 }
 0x110   : > { %v317_v50 = vpop.f32.mrb[9].mxu0  ;;  %v346_v52 = vmax.f32 %v315_v49, 0.0 }
 0x111   : > { %696 = vmatprep.subr.bf16.mxu1 %v695_v48  ;;  %v347_v55 = vmax.f32 %v317_v50, 0.0 }
 0x112   : > { %698 = vmatpush1.bf16.msra.mxu1 %v697_v47 }
 0x113   : > { %v321_v51 = vpop.f32.mrb[10].mxu0 }
 0x114   : > { %v348_v53 = vmax.f32 %v321_v51, 0.0  ;;  %v323_v54 = vpop.f32.mrb[11].mxu0 }
 0x115   : > { %v349_v56 = vmax.f32 %v323_v54, 0.0 }
 0x116   : > { %v701_v57 = vpack.c.bf16 %v348_v53, %v346_v52 }
 0x117   : > { %v699_v58 = vpack.c.bf16 %v349_v56, %v347_v55  ;;  %v327_v59 = vpop.f32.mrb[12].mxu0 }
 0x118   : > { %v329_v60 = vpop.f32.mrb[13].mxu0  ;;  %v350_v62 = vmax.f32 %v327_v59, 0.0 }
 0x119   : > { %700 = vmatprep.subr.bf16.mxu1 %v699_v58  ;;  %v351_v1 = vmax.f32 %v329_v60, 0.0 }
 0x11a   : > { %702 = vmatpush1.bf16.msra.mxu1 %v701_v57 }
 0x11b   : > { %v333_v61 = vpop.f32.mrb[14].mxu0 }
 0x11c   : > { %v352_v63 = vmax.f32 %v333_v61, 0.0  ;;  %v335_v0 = vpop.f32.mrb[15].mxu0 }
 0x11d   : > { %v353_v2 = vmax.f32 %v335_v0, 0.0 }
 0x11e   : > { %v705_v3 = vpack.c.bf16 %v352_v63, %v350_v62 }
 0x11f   : > { %v703_v4 = vpack.c.bf16 %v353_v2, %v351_v1 }
 0x121   : > { %704 = vmatprep.subr.bf16.mxu1 %v703_v4 }
 0x122   : > { %706 = vmatpush1.bf16.msra.mxu1 %v705_v3 }
 0x123   : > { %386 = vmatprep.subr.mxu1 %v900_v15 }
 0x126   : > { %387 = vmatpush1.msra.mxu1 %v903_v19 }
 0x127   : > { %670 = vmatmul.mubr.msk.f32.vlgmr.msra.gmra.mrb[0].mxu1 %vm354_vm1, %v194_v5 }
 0x128   : > { %440 = vmatprep.mubr.f32.mxu1 %v820_v8 }
 0x12b   : > { %671 = vmatmul.mubr.msk.f32.gmra.mrb[2].mxu1 %vm354_vm1, %v195_v6 }
 0x12c   : > { %446 = vmatprep.mubr.f32.mxu1 %v820_v8 }
 0x12f   : > { %672 = vmatmul.mubr.msk.f32.gmra.mrb[4].mxu1 %vm354_vm1, %v196_v7 }
 0x130   : > { %452 = vmatprep.mubr.f32.mxu1 %v820_v8 }
 0x133   : > { %673 = vmatmul.mubr.msk.f32.gmra.mrb[6].mxu1 %vm354_vm1, %v197_v9 }
 0x134   : > { %458 = vmatprep.mubr.f32.mxu1 %v820_v8 }
 0x137   : > { %674 = vmatmul.mubr.msk.f32.gmra.mrb[8].mxu1 %vm354_vm1, %v198_v10 }
 0x138   : > { %543 = vmatprep.mubr.f32.mxu1 %v820_v8 }
 0x1fa   : > { %v436_v11 = vpop.f32.mrb[0].mxu1 }
 0x1fb   : > { %v438_v12 = vpop.f32.mrb[1].mxu1  ;;  %v465_v14 = vmax.f32 %v436_v11, 0.0 }
 0x1fc   : > { %v466_v17 = vmax.f32 %v438_v12, 0.0 }
 0x1fe   : > { %v442_v13 = vpop.f32.mrb[2].mxu1 }
 0x1ff   : > { %v467_v15 = vmax.f32 %v442_v13, 0.0  ;;  %v444_v16 = vpop.f32.mrb[3].mxu1 }
 0x200   : > { %v468_v18 = vmax.f32 %v444_v16, 0.0 }
 0x201   : > { %v709_v19 = vpack.c.bf16 %v467_v15, %v465_v14 }
 0x202   : > { %v707_v20 = vpack.c.bf16 %v468_v18, %v466_v17  ;;  %v448_v21 = vpop.f32.mrb[4].mxu1 }
 0x203   : > { %v450_v22 = vpop.f32.mrb[5].mxu1  ;;  %v469_v24 = vmax.f32 %v448_v21, 0.0 }
 0x204   : > { %708 = vmatprep.subr.bf16.mxu1 %v707_v20  ;;  %v470_v27 = vmax.f32 %v450_v22, 0.0 }
 0x205   : > { %710 = vmatpush1.bf16.msra.mxu1 %v709_v19 }
 0x206   : > { %v454_v23 = vpop.f32.mrb[6].mxu1 }
 0x207   : > { %v471_v25 = vmax.f32 %v454_v23, 0.0  ;;  %v456_v26 = vpop.f32.mrb[7].mxu1 }
 0x208   : > { %v472_v8 = vmax.f32 %v456_v26, 0.0 }
 0x209   : > { %v713_v28 = vpack.c.bf16 %v471_v25, %v469_v24 }
 0x20a   : > { %v711_v29 = vpack.c.bf16 %v472_v8, %v470_v27  ;;  %v460_v30 = vpop.f32.mrb[8].mxu1 }
 0x20b   : > { %v462_v31 = vpop.f32.mrb[9].mxu1  ;;  %v473_v33 = vmax.f32 %v460_v30, 0.0 }
 0x20c   : > { %712 = vmatprep.subr.bf16.mxu1 %v711_v29  ;;  %v474_v32 = vmax.f32 %v462_v31, 0.0 }
 0x20d   : > { %714 = vmatpush1.bf16.msra.mxu1 %v713_v28 }
 0x20e   : > { %487 = vmatprep.subr.mxu1 %v474_v32 }
 0x211   : > { %488 = vmatpush1.msra.mxu1 %v473_v33 }
 0x212   : > { %675 = vmatmul.mubr.msk.f32.vlgmr.msra.gmra.mrb[10].mxu1 %vm475_vm2, %v199_v34 }
 0x2e5   : > { %v545_v40 = vpop.f32.mrb[10].mxu1 }
 0x2e6   : > { %v547_v42 = vpop.f32.mrb[11].mxu1 }
 0x2e7   : > { %v552_v43 = vcombine.low %v545_v40, %v547_v42 }
 0x2e9   : > { %v559_v44 = vrot.slane %v552_v43, %v558_v41 }
 0x2eb   : > { %v566_v45 = vrot.slane %v559_v44, %v558_v41 }
 0x2ed   : > { %572 = vst.msk [vmem:[%s175_s24] sm:$0x3] %vm570_vm3, %v566_v45 }
 0x2ee   : > { %769 = shalt.err (!%p766_p5)
}
 0x2ef   : > { %s770_s28 = scalar_lea.hbm %s976_s29, 32  ;;  %s774_s8 = scalar_lea.hbm %s1022_s2, 64 }
 0x2f0   : > { %p771_p7 = scmp.ne.s32.totalorder %s976_s29, %s770_s28  ;;  %p775_p12 = scmp.lt.u32.totalorder %s976_s29, %s1022_s2 }
 0x2f1   : > { %p776_p13 = scmp.lt.u32.totalorder %s774_s8, %s770_s28  ;;  %p778_p1 = scmp.lt.u32.totalorder %s770_s28, %s976_s29 }
 0x2f2   : > { %p772_p10 = pnand %p771_p7, %p876_p6 }
 0x2f3   : > { %p777_p0 = por %p776_p13, %p775_p12 }
 0x2f4   : > { %p773_p11 = pneg %p772_p10 }
 0x2f5   : > { %p779_p2 = por %p778_p1, %p777_p0 }
 0x2f7   : > { %p780_p3 = pnand %p779_p2, %p773_p11 }
 0x2f9   : > { %783 = shalt.err (!%p780_p3)
}
 0x2fa   : > { %715 = dma.vmem_to_hbm [thread:$0]  (%p876_p6), %s978_s25, 32, %s976_s29, %s574_s30  }
 0x2fb PF: > { %s600_s17 = sand.u32 1, %s806_s9   ;;  %p718_p4 = pnand %p655_p9, %p880_p8 }
 0x2fc   : > { %s601_s21 = scalar_lea.sflag [#allocation4], %s600_s17 }
 0x2fd   : > { %801 = dma.done.wait (!%p718_p4), %s601_s21, 32  }
 0x2fe   : > { %803 = vsyncadd (!%p718_p4), %s601_s21, 4294967264  ;;  %p12_p5 = scmp.ge.s32.totalorder %s861_s15, 4   ;;  %s1025_s9 = smov %s810_s10 }
 0x2ff   : > { %s1026_s10 = smov %s814_s11  ;;  %s1027_s11 = smov %s874_s18 }
 0x300   : > { %s1028_s12 = smov %s861_s15  ;;  %14 = sbr.rel (!%p12_p5) target bundleno = 3 (0x3), region = 91 }
 0x307   :  { %606 = vsyncpa [#allocation4], 1 }
 0x308   :  { %608 = vsyncpa [#allocation4 + $0x1], 1 }

</bundles_post_ra>
